<compile_context>
chip_gen: v5e
topology: v5e:2x2
jax: 0.10.0
libtpu: 0.0.40
codegen_flags: <defaults>
</compile_context>

<pallas_src>
import functools

import jax
import jax.numpy as jnp
from jax.experimental import pallas as pl
from jax.experimental.pallas import tpu as pltpu


def _round_up(a, b):
    return (a + b - 1) // b * b


def decoder_kernel(xT_ref, zprojT_ref, w0xT_ref, w1T_ref, b1_ref, w2T_ref, b2_ref,
                   out_ref, *, n_samples, out_dim):
    """One N-tile; all S samples handled in-kernel.

    xT_ref     : [x_dim_pad, tile_n]   transposed x tile (N on lanes)
    zprojT_ref : [h0, S]               per-sample  W0z @ z_s + b0  (hoisted)
    w0xT_ref   : [h0, x_dim_pad]       first-layer weights for the x features
    w1T_ref    : [h1, h0]              torch-layout (out, in) weights
    b1_ref     : [h1, 1]
    w2T_ref    : [out_dim, h1]
    b2_ref     : [out_dim, 1]
    out_ref    : [2*S*out_dim, tile_n] rows 0..S*out_dim-1 = mean, rest = std
    """
    tile_n = xT_ref.shape[1]

    # x contribution of the first layer: computed ONCE per tile, reused for all S.
    xw0 = jnp.dot(w0xT_ref[...], xT_ref[...],
                  preferred_element_type=jnp.float32)              # [h0, tile_n]

    zproj = zprojT_ref[...]                                        # [h0, S]
    w1 = w1T_ref[...]
    w2 = w2T_ref[...]
    # Hoist the loop-invariant bias broadcasts out of the sample loop.
    b1 = jnp.broadcast_to(b1_ref[...], (w1.shape[0], tile_n))
    b2 = jnp.broadcast_to(b2_ref[...], (w2.shape[0], tile_n))

    for s in range(n_samples):                                     # S is small & static
        h = jnp.maximum(xw0 + zproj[:, s:s + 1], 0.0)              # layer0 + ReLU
        h = jnp.maximum(jnp.dot(w1, h, preferred_element_type=jnp.float32) + b1,
                        0.0)                                       # layer1 + ReLU
        out = jnp.dot(w2, h, preferred_element_type=jnp.float32) + b2   # [out_dim, tile_n]

        # y_logvar = softplus(MLP(xz)) == softplus(out) (same weights, same input).
        # Numerically stable softplus: max(x,0) + log(1 + exp(-|x|)).
        sp = jnp.maximum(out, 0.0) + jnp.log(1.0 + jnp.exp(-jnp.abs(out)))

        out_ref[s * out_dim:(s + 1) * out_dim, :] = out.astype(out_ref.dtype)
        out_ref[(n_samples + s) * out_dim:(n_samples + s + 1) * out_dim, :] = (
            jnp.exp(0.5 * sp).astype(out_ref.dtype))


def decoder_forward(x, z, params, *, tile_n=2048):
    """x: [N, x_dim], z: [z_dim, S] -> (y_mean, y_std), each [S, N, out_dim].

    params: [(w0, b0), (w1, b1), (w2, b2)] with torch-layout weights w_k of
    shape (out, in) and biases b_k of shape (out,).
    """
    x = x.astype(jnp.float32)
    zt = z.T.astype(jnp.float32)                       # [S, z_dim]
    n, x_dim = x.shape
    n_samples, z_dim = zt.shape

    (w0, b0), (w1, b1), (w2, b2) = params
    h0, h1, out_dim = w0.shape[0], w1.shape[0], w2.shape[0]
    w0x = w0[:, :x_dim]                                # [h0, x_dim]
    w0z = w0[:, x_dim:]                                # [h0, z_dim]

    # Hoisted per-sample first-layer z contribution (incl. bias): [h0, S].
    zprojT = (w0z @ zt.T + b0[:, None]).astype(jnp.float32)

    # Transposed dataflow: N on the lane axis. Pad the tiny contraction dim
    # (x_dim) to a sublane multiple; pad N to a lane-aligned tile multiple.
    x_dim_pad = _round_up(x_dim, 8)
    tile_n = _round_up(min(tile_n, _round_up(n, 128)), 128)
    n_pad = _round_up(n, tile_n)

    xT = x.T                                           # [x_dim, N]
    xT = jnp.pad(xT, ((0, x_dim_pad - x_dim), (0, n_pad - n)))
    w0x = jnp.pad(w0x, ((0, 0), (0, x_dim_pad - x_dim)))

    rows = 2 * n_samples * out_dim
    grid = (n_pad // tile_n,)

    def const(shape):
        return pl.BlockSpec(shape, lambda i: (0, 0))

    out = pl.pallas_call(
        functools.partial(decoder_kernel, n_samples=n_samples, out_dim=out_dim),
        out_shape=jax.ShapeDtypeStruct((rows, n_pad), jnp.float32),
        grid=grid,
        in_specs=[
            pl.BlockSpec((x_dim_pad, tile_n), lambda i: (0, i)),   # x tile
            const((h0, n_samples)),                                # zproj table
            const((h0, x_dim_pad)),                                # W0x^T
            const((h1, h0)),                                       # W1 (out,in)
            const((h1, 1)),                                        # b1
            const((out_dim, h1)),                                  # W2 (out,in)
            const((out_dim, 1)),                                   # b2
        ],
        out_specs=pl.BlockSpec((rows, tile_n), lambda i: (0, i)),
        compiler_params=pltpu.CompilerParams(dimension_semantics=("parallel",)),
    )(xT, zprojT, w0x, w1, b1[:, None], w2, b2[:, None])

    out = out[:, :n].reshape(2, n_samples, out_dim, n)
    y_mean = jnp.transpose(out[0], (0, 2, 1))          # [S, N, out_dim]
    y_std = jnp.transpose(out[1], (0, 2, 1))
    return y_mean, y_std


def init_params(key, input_dim, decoder_specs):
    """decoder_specs: list of (out_dim, activation_or_None). Torch-layout
    weights (out, in). torch.nn.init.normal_ draws N(0,1); here we scale by
    1/sqrt(fan_in) purely to keep the deep ReLU stack numerically
    well-conditioned for the f32 correctness check (init scale does not change
    the forward-pass semantics)."""
    params = []
    d_prev = input_dim
    for i, (d_out, _act) in enumerate(decoder_specs):
        key, k_w = jax.random.split(key)
        w = jax.random.normal(k_w, (d_out, d_prev), jnp.float32) / jnp.sqrt(
            jnp.float32(d_prev))
        b = (0.01 * (i + 1)) * jnp.ones((d_out,), jnp.float32)
        params.append((w, b))
        d_prev = d_out
    return params


def decoder_reference(x, z, params):
    """Plain-JAX reference that mirrors the torch forward literally
    (broadcast + concat, two identical MLP passes, softplus, exp)."""
    x = x.astype(jnp.float32)
    zt = z.T.astype(jnp.float32)                       # [S, z_dim]
    s, n = zt.shape[0], x.shape[0]
    x_rep = jnp.broadcast_to(x[None, :, :], (s, n, x.shape[1]))
    z_rep = jnp.broadcast_to(zt[:, None, :], (s, n, zt.shape[1]))
    xz = jnp.concatenate([x_rep, z_rep], axis=2)

    def mlp(h):
        (w0, b0), (w1, b1), (w2, b2) = params          # torch layout (out, in)
        h = jnp.maximum(h @ w0.T + b0, 0.0)
        h = jnp.maximum(h @ w1.T + b1, 0.0)
        return h @ w2.T + b2

    y_mean = mlp(xz)
    y_logvar = mlp(xz)
    y_logvar = jax.nn.softplus(y_logvar)
    y_std = jnp.exp(0.5 * y_logvar)
    return y_mean, y_std


if __name__ == "__main__":
    key = jax.random.PRNGKey(0)
    k_x, k_z, k_p, k_x2, k_z2, k_p2 = jax.random.split(key, 6)

    decoder_specs = [(32, "relu"), (32, "relu"), (2, None)]
    out_dim = decoder_specs[-1][0]

    # Config 1: tiny shapes (N=8 targets, x_dim=3, z_dim=4, 6 latent samples).
    N, x_dim, z_dim, S = 8, 3, 4, 6
    x = jax.random.normal(k_x, (N, x_dim), dtype=jnp.float32)
    z = jax.random.normal(k_z, (z_dim, S), dtype=jnp.float32)
    params = init_params(k_p, x_dim + z_dim, decoder_specs)

    y_mean, y_std = decoder_forward(x, z, params)
    jax.block_until_ready((y_mean, y_std))
    ym_ref, ys_ref = decoder_reference(x, z, params)
    assert y_mean.shape == (S, N, out_dim)
    assert y_std.shape == (S, N, out_dim)
    assert jnp.allclose(y_mean, ym_ref, atol=1e-4, rtol=1e-4), "y_mean mismatch"
    assert jnp.allclose(y_std, ys_ref, atol=1e-4, rtol=1e-4), "y_std mismatch"

    # Config 2: exercises N padding and a multi-tile grid (n_pad=384, 3 tiles).
    N2, S2 = 300, 5
    x2 = jax.random.normal(k_x2, (N2, x_dim), dtype=jnp.float32)
    z2 = jax.random.normal(k_z2, (z_dim, S2), dtype=jnp.float32)
    params2 = init_params(k_p2, x_dim + z_dim, decoder_specs)
    ym2, ys2 = decoder_forward(x2, z2, params2, tile_n=128)
    jax.block_until_ready((ym2, ys2))
    ym2_ref, ys2_ref = decoder_reference(x2, z2, params2)
    assert ym2.shape == (S2, N2, out_dim)
    assert jnp.allclose(ym2, ym2_ref, atol=1e-4, rtol=1e-4), "y_mean mismatch (tiled)"
    assert jnp.allclose(ys2, ys2_ref, atol=1e-4, rtol=1e-4), "y_std mismatch (tiled)"

    print("KERNEL_OK")
</pallas_src>

<mosaic_0001>
module attributes {stable_mosaic.version = 11 : i64} {
  func.func @decoder_kernel(%arg0: i32, %arg1: memref<8x128xf32, #tpu.memory_space<vmem>>, %arg2: memref<32x6xf32, #tpu.memory_space<vmem>>, %arg3: memref<32x8xf32, #tpu.memory_space<vmem>>, %arg4: memref<32x32xf32, #tpu.memory_space<vmem>>, %arg5: memref<32x1xf32, #tpu.memory_space<vmem>>, %arg6: memref<2x32xf32, #tpu.memory_space<vmem>>, %arg7: memref<2x1xf32, #tpu.memory_space<vmem>>, %arg8: memref<24x128xf32, #tpu.memory_space<vmem>>) attributes {dimension_semantics = [#tpu.dimension_semantics<parallel>], iteration_bounds = array<i64: 1>, scalar_prefetch = 0 : i64, scratch_operands = 0 : i64, tpu.core_type = #tpu.core_type<tc>, window_params = [{transform_indices = @transform_0, window_bounds = array<i64: 8, 128>}, {pipeline_mode = #tpu.pipeline_mode<synchronous>, transform_indices = @transform_1, window_bounds = array<i64: 32, 6>}, {pipeline_mode = #tpu.pipeline_mode<synchronous>, transform_indices = @transform_2, window_bounds = array<i64: 32, 8>}, {pipeline_mode = #tpu.pipeline_mode<synchronous>, transform_indices = @transform_3, window_bounds = array<i64: 32, 32>}, {pipeline_mode = #tpu.pipeline_mode<synchronous>, transform_indices = @transform_4, window_bounds = array<i64: 32, 1>}, {pipeline_mode = #tpu.pipeline_mode<synchronous>, transform_indices = @transform_5, window_bounds = array<i64: 2, 32>}, {pipeline_mode = #tpu.pipeline_mode<synchronous>, transform_indices = @transform_6, window_bounds = array<i64: 2, 1>}, {transform_indices = @transform_7, window_bounds = array<i64: 24, 128>}]} {
    %c0 = arith.constant 0 : index
    %c0_0 = arith.constant 0 : index
    %0 = vector.load %arg3[%c0, %c0_0] : memref<32x8xf32, #tpu.memory_space<vmem>>, vector<32x8xf32>
    %c0_1 = arith.constant 0 : index
    %c0_2 = arith.constant 0 : index
    %1 = vector.load %arg1[%c0_1, %c0_2] : memref<8x128xf32, #tpu.memory_space<vmem>>, vector<8x128xf32>
    %cst = arith.constant dense<0.000000e+00> : vector<32x128xf32>
    %2 = tpu.matmul %0, %1, %cst {dimension_numbers = #tpu.dot_dimension_numbers<[1], [0], [0], [1], [0, 0, 1, 1], [], []>} : vector<32x8xf32>, vector<8x128xf32>, vector<32x128xf32> -> vector<32x128xf32>
    %c0_3 = arith.constant 0 : index
    %c0_4 = arith.constant 0 : index
    %3 = vector.load %arg2[%c0_3, %c0_4] : memref<32x6xf32, #tpu.memory_space<vmem>>, vector<32x6xf32>
    %c0_5 = arith.constant 0 : index
    %c0_6 = arith.constant 0 : index
    %4 = vector.load %arg4[%c0_5, %c0_6] : memref<32x32xf32, #tpu.memory_space<vmem>>, vector<32x32xf32>
    %c0_7 = arith.constant 0 : index
    %c0_8 = arith.constant 0 : index
    %5 = vector.load %arg6[%c0_7, %c0_8] : memref<2x32xf32, #tpu.memory_space<vmem>>, vector<2x32xf32>
    %c0_9 = arith.constant 0 : index
    %c0_10 = arith.constant 0 : index
    %6 = vector.load %arg5[%c0_9, %c0_10] : memref<32x1xf32, #tpu.memory_space<vmem>>, vector<32x1xf32>
    %7 = vector.shape_cast %6 : vector<32x1xf32> to vector<32x1xf32>
    %8 = vector.broadcast %7 : vector<32x1xf32> to vector<32x128xf32>
    %c0_11 = arith.constant 0 : index
    %c0_12 = arith.constant 0 : index
    %9 = vector.load %arg7[%c0_11, %c0_12] : memref<2x1xf32, #tpu.memory_space<vmem>>, vector<2x1xf32>
    %10 = vector.shape_cast %9 : vector<2x1xf32> to vector<2x1xf32>
    %11 = vector.broadcast %10 : vector<2x1xf32> to vector<2x128xf32>
    %12 = vector.extract_strided_slice %3 {offsets = [0, 0], sizes = [32, 1], strides = [1, 1]} : vector<32x6xf32> to vector<32x1xf32>
    %13 = vector.broadcast %12 : vector<32x1xf32> to vector<32x128xf32>
    %14 = arith.addf %2, %13 : vector<32x128xf32>
    %cst_13 = arith.constant 0.000000e+00 : f32
    %15 = vector.broadcast %cst_13 : f32 to vector<32x128xf32>
    %16 = arith.maximumf %14, %15 : vector<32x128xf32>
    %cst_14 = arith.constant dense<0.000000e+00> : vector<32x128xf32>
    %17 = tpu.matmul %4, %16, %cst_14 {dimension_numbers = #tpu.dot_dimension_numbers<[1], [0], [0], [1], [0, 0, 1, 1], [], []>} : vector<32x32xf32>, vector<32x128xf32>, vector<32x128xf32> -> vector<32x128xf32>
    %18 = arith.addf %17, %8 : vector<32x128xf32>
    %cst_15 = arith.constant 0.000000e+00 : f32
    %19 = vector.broadcast %cst_15 : f32 to vector<32x128xf32>
    %20 = arith.maximumf %18, %19 : vector<32x128xf32>
    %cst_16 = arith.constant dense<0.000000e+00> : vector<2x128xf32>
    %21 = tpu.matmul %5, %20, %cst_16 {dimension_numbers = #tpu.dot_dimension_numbers<[1], [0], [0], [1], [0, 0, 1, 1], [], []>} : vector<2x32xf32>, vector<32x128xf32>, vector<2x128xf32> -> vector<2x128xf32>
    %22 = arith.addf %21, %11 : vector<2x128xf32>
    %cst_17 = arith.constant 0.000000e+00 : f32
    %23 = vector.broadcast %cst_17 : f32 to vector<2x128xf32>
    %24 = arith.maximumf %22, %23 : vector<2x128xf32>
    %25 = math.absf %22 : vector<2x128xf32>
    %cst_18 = arith.constant 0.000000e+00 : f32
    %26 = vector.broadcast %cst_18 : f32 to vector<2x128xf32>
    %27 = arith.subf %26, %25 : vector<2x128xf32>
    %28 = math.exp %27 : vector<2x128xf32>
    %cst_19 = arith.constant 1.000000e+00 : f32
    %29 = vector.broadcast %cst_19 : f32 to vector<2x128xf32>
    %30 = arith.addf %29, %28 : vector<2x128xf32>
    %31 = math.log %30 : vector<2x128xf32>
    %32 = arith.addf %24, %31 : vector<2x128xf32>
    %c0_20 = arith.constant 0 : index
    %c0_21 = arith.constant 0 : index
    %33 = vector.load %arg8[%c0_20, %c0_21] : memref<24x128xf32, #tpu.memory_space<vmem>>, vector<2x128xf32>
    tpu.vector_store %arg8[%c0_20, %c0_21], %22 {strides = array<i32>} : memref<24x128xf32, #tpu.memory_space<vmem>>, vector<2x128xf32>,
    %cst_22 = arith.constant 5.000000e-01 : f32
    %34 = vector.broadcast %cst_22 : f32 to vector<2x128xf32>
    %35 = arith.mulf %34, %32 : vector<2x128xf32>
    %36 = math.exp %35 : vector<2x128xf32>
    %c12 = arith.constant 12 : index
    %c0_23 = arith.constant 0 : index
    %37 = vector.load %arg8[%c12, %c0_23] : memref<24x128xf32, #tpu.memory_space<vmem>>, vector<2x128xf32>
    tpu.vector_store %arg8[%c12, %c0_23], %36 {strides = array<i32>} : memref<24x128xf32, #tpu.memory_space<vmem>>, vector<2x128xf32>,
    %38 = vector.extract_strided_slice %3 {offsets = [0, 1], sizes = [32, 1], strides = [1, 1]} : vector<32x6xf32> to vector<32x1xf32>
    %39 = vector.broadcast %38 : vector<32x1xf32> to vector<32x128xf32>
    %40 = arith.addf %2, %39 : vector<32x128xf32>
    %cst_24 = arith.constant 0.000000e+00 : f32
    %41 = vector.broadcast %cst_24 : f32 to vector<32x128xf32>
    %42 = arith.maximumf %40, %41 : vector<32x128xf32>
    %cst_25 = arith.constant dense<0.000000e+00> : vector<32x128xf32>
    %43 = tpu.matmul %4, %42, %cst_25 {dimension_numbers = #tpu.dot_dimension_numbers<[1], [0], [0], [1], [0, 0, 1, 1], [], []>} : vector<32x32xf32>, vector<32x128xf32>, vector<32x128xf32> -> vector<32x128xf32>
    %44 = arith.addf %43, %8 : vector<32x128xf32>
    %cst_26 = arith.constant 0.000000e+00 : f32
    %45 = vector.broadcast %cst_26 : f32 to vector<32x128xf32>
    %46 = arith.maximumf %44, %45 : vector<32x128xf32>
    %cst_27 = arith.constant dense<0.000000e+00> : vector<2x128xf32>
    %47 = tpu.matmul %5, %46, %cst_27 {dimension_numbers = #tpu.dot_dimension_numbers<[1], [0], [0], [1], [0, 0, 1, 1], [], []>} : vector<2x32xf32>, vector<32x128xf32>, vector<2x128xf32> -> vector<2x128xf32>
    %48 = arith.addf %47, %11 : vector<2x128xf32>
    %cst_28 = arith.constant 0.000000e+00 : f32
    %49 = vector.broadcast %cst_28 : f32 to vector<2x128xf32>
    %50 = arith.maximumf %48, %49 : vector<2x128xf32>
    %51 = math.absf %48 : vector<2x128xf32>
    %cst_29 = arith.constant 0.000000e+00 : f32
    %52 = vector.broadcast %cst_29 : f32 to vector<2x128xf32>
    %53 = arith.subf %52, %51 : vector<2x128xf32>
    %54 = math.exp %53 : vector<2x128xf32>
    %cst_30 = arith.constant 1.000000e+00 : f32
    %55 = vector.broadcast %cst_30 : f32 to vector<2x128xf32>
    %56 = arith.addf %55, %54 : vector<2x128xf32>
    %57 = math.log %56 : vector<2x128xf32>
    %58 = arith.addf %50, %57 : vector<2x128xf32>
    %c2 = arith.constant 2 : index
    %c0_31 = arith.constant 0 : index
    %59 = vector.load %arg8[%c2, %c0_31] : memref<24x128xf32, #tpu.memory_space<vmem>>, vector<2x128xf32>
    tpu.vector_store %arg8[%c2, %c0_31], %48 {strides = array<i32>} : memref<24x128xf32, #tpu.memory_space<vmem>>, vector<2x128xf32>,
    %cst_32 = arith.constant 5.000000e-01 : f32
    %60 = vector.broadcast %cst_32 : f32 to vector<2x128xf32>
    %61 = arith.mulf %60, %58 : vector<2x128xf32>
    %62 = math.exp %61 : vector<2x128xf32>
    %c14 = arith.constant 14 : index
    %c0_33 = arith.constant 0 : index
    %63 = vector.load %arg8[%c14, %c0_33] : memref<24x128xf32, #tpu.memory_space<vmem>>, vector<2x128xf32>
    tpu.vector_store %arg8[%c14, %c0_33], %62 {strides = array<i32>} : memref<24x128xf32, #tpu.memory_space<vmem>>, vector<2x128xf32>,
    %64 = vector.extract_strided_slice %3 {offsets = [0, 2], sizes = [32, 1], strides = [1, 1]} : vector<32x6xf32> to vector<32x1xf32>
    %65 = vector.broadcast %64 : vector<32x1xf32> to vector<32x128xf32>
    %66 = arith.addf %2, %65 : vector<32x128xf32>
    %cst_34 = arith.constant 0.000000e+00 : f32
    %67 = vector.broadcast %cst_34 : f32 to vector<32x128xf32>
    %68 = arith.maximumf %66, %67 : vector<32x128xf32>
    %cst_35 = arith.constant dense<0.000000e+00> : vector<32x128xf32>
    %69 = tpu.matmul %4, %68, %cst_35 {dimension_numbers = #tpu.dot_dimension_numbers<[1], [0], [0], [1], [0, 0, 1, 1], [], []>} : vector<32x32xf32>, vector<32x128xf32>, vector<32x128xf32> -> vector<32x128xf32>
    %70 = arith.addf %69, %8 : vector<32x128xf32>
    %cst_36 = arith.constant 0.000000e+00 : f32
    %71 = vector.broadcast %cst_36 : f32 to vector<32x128xf32>
    %72 = arith.maximumf %70, %71 : vector<32x128xf32>
    %cst_37 = arith.constant dense<0.000000e+00> : vector<2x128xf32>
    %73 = tpu.matmul %5, %72, %cst_37 {dimension_numbers = #tpu.dot_dimension_numbers<[1], [0], [0], [1], [0, 0, 1, 1], [], []>} : vector<2x32xf32>, vector<32x128xf32>, vector<2x128xf32> -> vector<2x128xf32>
    %74 = arith.addf %73, %11 : vector<2x128xf32>
    %cst_38 = arith.constant 0.000000e+00 : f32
    %75 = vector.broadcast %cst_38 : f32 to vector<2x128xf32>
    %76 = arith.maximumf %74, %75 : vector<2x128xf32>
    %77 = math.absf %74 : vector<2x128xf32>
    %cst_39 = arith.constant 0.000000e+00 : f32
    %78 = vector.broadcast %cst_39 : f32 to vector<2x128xf32>
    %79 = arith.subf %78, %77 : vector<2x128xf32>
    %80 = math.exp %79 : vector<2x128xf32>
    %cst_40 = arith.constant 1.000000e+00 : f32
    %81 = vector.broadcast %cst_40 : f32 to vector<2x128xf32>
    %82 = arith.addf %81, %80 : vector<2x128xf32>
    %83 = math.log %82 : vector<2x128xf32>
    %84 = arith.addf %76, %83 : vector<2x128xf32>
    %c4 = arith.constant 4 : index
    %c0_41 = arith.constant 0 : index
    %85 = vector.load %arg8[%c4, %c0_41] : memref<24x128xf32, #tpu.memory_space<vmem>>, vector<2x128xf32>
    tpu.vector_store %arg8[%c4, %c0_41], %74 {strides = array<i32>} : memref<24x128xf32, #tpu.memory_space<vmem>>, vector<2x128xf32>,
    %cst_42 = arith.constant 5.000000e-01 : f32
    %86 = vector.broadcast %cst_42 : f32 to vector<2x128xf32>
    %87 = arith.mulf %86, %84 : vector<2x128xf32>
    %88 = math.exp %87 : vector<2x128xf32>
    %c16 = arith.constant 16 : index
    %c0_43 = arith.constant 0 : index
    %89 = vector.load %arg8[%c16, %c0_43] : memref<24x128xf32, #tpu.memory_space<vmem>>, vector<2x128xf32>
    tpu.vector_store %arg8[%c16, %c0_43], %88 {strides = array<i32>} : memref<24x128xf32, #tpu.memory_space<vmem>>, vector<2x128xf32>,
    %90 = vector.extract_strided_slice %3 {offsets = [0, 3], sizes = [32, 1], strides = [1, 1]} : vector<32x6xf32> to vector<32x1xf32>
    %91 = vector.broadcast %90 : vector<32x1xf32> to vector<32x128xf32>
    %92 = arith.addf %2, %91 : vector<32x128xf32>
    %cst_44 = arith.constant 0.000000e+00 : f32
    %93 = vector.broadcast %cst_44 : f32 to vector<32x128xf32>
    %94 = arith.maximumf %92, %93 : vector<32x128xf32>
    %cst_45 = arith.constant dense<0.000000e+00> : vector<32x128xf32>
    %95 = tpu.matmul %4, %94, %cst_45 {dimension_numbers = #tpu.dot_dimension_numbers<[1], [0], [0], [1], [0, 0, 1, 1], [], []>} : vector<32x32xf32>, vector<32x128xf32>, vector<32x128xf32> -> vector<32x128xf32>
    %96 = arith.addf %95, %8 : vector<32x128xf32>
    %cst_46 = arith.constant 0.000000e+00 : f32
    %97 = vector.broadcast %cst_46 : f32 to vector<32x128xf32>
    %98 = arith.maximumf %96, %97 : vector<32x128xf32>
    %cst_47 = arith.constant dense<0.000000e+00> : vector<2x128xf32>
    %99 = tpu.matmul %5, %98, %cst_47 {dimension_numbers = #tpu.dot_dimension_numbers<[1], [0], [0], [1], [0, 0, 1, 1], [], []>} : vector<2x32xf32>, vector<32x128xf32>, vector<2x128xf32> -> vector<2x128xf32>
    %100 = arith.addf %99, %11 : vector<2x128xf32>
    %cst_48 = arith.constant 0.000000e+00 : f32
    %101 = vector.broadcast %cst_48 : f32 to vector<2x128xf32>
    %102 = arith.maximumf %100, %101 : vector<2x128xf32>
    %103 = math.absf %100 : vector<2x128xf32>
    %cst_49 = arith.constant 0.000000e+00 : f32
    %104 = vector.broadcast %cst_49 : f32 to vector<2x128xf32>
    %105 = arith.subf %104, %103 : vector<2x128xf32>
    %106 = math.exp %105 : vector<2x128xf32>
    %cst_50 = arith.constant 1.000000e+00 : f32
    %107 = vector.broadcast %cst_50 : f32 to vector<2x128xf32>
    %108 = arith.addf %107, %106 : vector<2x128xf32>
    %109 = math.log %108 : vector<2x128xf32>
    %110 = arith.addf %102, %109 : vector<2x128xf32>
    %c6 = arith.constant 6 : index
    %c0_51 = arith.constant 0 : index
    %111 = vector.load %arg8[%c6, %c0_51] : memref<24x128xf32, #tpu.memory_space<vmem>>, vector<2x128xf32>
    tpu.vector_store %arg8[%c6, %c0_51], %100 {strides = array<i32>} : memref<24x128xf32, #tpu.memory_space<vmem>>, vector<2x128xf32>,
    %cst_52 = arith.constant 5.000000e-01 : f32
    %112 = vector.broadcast %cst_52 : f32 to vector<2x128xf32>
    %113 = arith.mulf %112, %110 : vector<2x128xf32>
    %114 = math.exp %113 : vector<2x128xf32>
    %c18 = arith.constant 18 : index
    %c0_53 = arith.constant 0 : index
    %115 = vector.load %arg8[%c18, %c0_53] : memref<24x128xf32, #tpu.memory_space<vmem>>, vector<2x128xf32>
    tpu.vector_store %arg8[%c18, %c0_53], %114 {strides = array<i32>} : memref<24x128xf32, #tpu.memory_space<vmem>>, vector<2x128xf32>,
    %116 = vector.extract_strided_slice %3 {offsets = [0, 4], sizes = [32, 1], strides = [1, 1]} : vector<32x6xf32> to vector<32x1xf32>
    %117 = vector.broadcast %116 : vector<32x1xf32> to vector<32x128xf32>
    %118 = arith.addf %2, %117 : vector<32x128xf32>
    %cst_54 = arith.constant 0.000000e+00 : f32
    %119 = vector.broadcast %cst_54 : f32 to vector<32x128xf32>
    %120 = arith.maximumf %118, %119 : vector<32x128xf32>
    %cst_55 = arith.constant dense<0.000000e+00> : vector<32x128xf32>
    %121 = tpu.matmul %4, %120, %cst_55 {dimension_numbers = #tpu.dot_dimension_numbers<[1], [0], [0], [1], [0, 0, 1, 1], [], []>} : vector<32x32xf32>, vector<32x128xf32>, vector<32x128xf32> -> vector<32x128xf32>
    %122 = arith.addf %121, %8 : vector<32x128xf32>
    %cst_56 = arith.constant 0.000000e+00 : f32
    %123 = vector.broadcast %cst_56 : f32 to vector<32x128xf32>
    %124 = arith.maximumf %122, %123 : vector<32x128xf32>
    %cst_57 = arith.constant dense<0.000000e+00> : vector<2x128xf32>
    %125 = tpu.matmul %5, %124, %cst_57 {dimension_numbers = #tpu.dot_dimension_numbers<[1], [0], [0], [1], [0, 0, 1, 1], [], []>} : vector<2x32xf32>, vector<32x128xf32>, vector<2x128xf32> -> vector<2x128xf32>
    %126 = arith.addf %125, %11 : vector<2x128xf32>
    %cst_58 = arith.constant 0.000000e+00 : f32
    %127 = vector.broadcast %cst_58 : f32 to vector<2x128xf32>
    %128 = arith.maximumf %126, %127 : vector<2x128xf32>
    %129 = math.absf %126 : vector<2x128xf32>
    %cst_59 = arith.constant 0.000000e+00 : f32
    %130 = vector.broadcast %cst_59 : f32 to vector<2x128xf32>
    %131 = arith.subf %130, %129 : vector<2x128xf32>
    %132 = math.exp %131 : vector<2x128xf32>
    %cst_60 = arith.constant 1.000000e+00 : f32
    %133 = vector.broadcast %cst_60 : f32 to vector<2x128xf32>
    %134 = arith.addf %133, %132 : vector<2x128xf32>
    %135 = math.log %134 : vector<2x128xf32>
    %136 = arith.addf %128, %135 : vector<2x128xf32>
    %c8 = arith.constant 8 : index
    %c0_61 = arith.constant 0 : index
    %137 = vector.load %arg8[%c8, %c0_61] : memref<24x128xf32, #tpu.memory_space<vmem>>, vector<2x128xf32>
    tpu.vector_store %arg8[%c8, %c0_61], %126 {strides = array<i32>} : memref<24x128xf32, #tpu.memory_space<vmem>>, vector<2x128xf32>,
    %cst_62 = arith.constant 5.000000e-01 : f32
    %138 = vector.broadcast %cst_62 : f32 to vector<2x128xf32>
    %139 = arith.mulf %138, %136 : vector<2x128xf32>
    %140 = math.exp %139 : vector<2x128xf32>
    %c20 = arith.constant 20 : index
    %c0_63 = arith.constant 0 : index
    %141 = vector.load %arg8[%c20, %c0_63] : memref<24x128xf32, #tpu.memory_space<vmem>>, vector<2x128xf32>
    tpu.vector_store %arg8[%c20, %c0_63], %140 {strides = array<i32>} : memref<24x128xf32, #tpu.memory_space<vmem>>, vector<2x128xf32>,
    %142 = vector.extract_strided_slice %3 {offsets = [0, 5], sizes = [32, 1], strides = [1, 1]} : vector<32x6xf32> to vector<32x1xf32>
    %143 = vector.broadcast %142 : vector<32x1xf32> to vector<32x128xf32>
    %144 = arith.addf %2, %143 : vector<32x128xf32>
    %cst_64 = arith.constant 0.000000e+00 : f32
    %145 = vector.broadcast %cst_64 : f32 to vector<32x128xf32>
    %146 = arith.maximumf %144, %145 : vector<32x128xf32>
    %cst_65 = arith.constant dense<0.000000e+00> : vector<32x128xf32>
    %147 = tpu.matmul %4, %146, %cst_65 {dimension_numbers = #tpu.dot_dimension_numbers<[1], [0], [0], [1], [0, 0, 1, 1], [], []>} : vector<32x32xf32>, vector<32x128xf32>, vector<32x128xf32> -> vector<32x128xf32>
    %148 = arith.addf %147, %8 : vector<32x128xf32>
    %cst_66 = arith.constant 0.000000e+00 : f32
    %149 = vector.broadcast %cst_66 : f32 to vector<32x128xf32>
    %150 = arith.maximumf %148, %149 : vector<32x128xf32>
    %cst_67 = arith.constant dense<0.000000e+00> : vector<2x128xf32>
    %151 = tpu.matmul %5, %150, %cst_67 {dimension_numbers = #tpu.dot_dimension_numbers<[1], [0], [0], [1], [0, 0, 1, 1], [], []>} : vector<2x32xf32>, vector<32x128xf32>, vector<2x128xf32> -> vector<2x128xf32>
    %152 = arith.addf %151, %11 : vector<2x128xf32>
    %cst_68 = arith.constant 0.000000e+00 : f32
    %153 = vector.broadcast %cst_68 : f32 to vector<2x128xf32>
    %154 = arith.maximumf %152, %153 : vector<2x128xf32>
    %155 = math.absf %152 : vector<2x128xf32>
    %cst_69 = arith.constant 0.000000e+00 : f32
    %156 = vector.broadcast %cst_69 : f32 to vector<2x128xf32>
    %157 = arith.subf %156, %155 : vector<2x128xf32>
    %158 = math.exp %157 : vector<2x128xf32>
    %cst_70 = arith.constant 1.000000e+00 : f32
    %159 = vector.broadcast %cst_70 : f32 to vector<2x128xf32>
    %160 = arith.addf %159, %158 : vector<2x128xf32>
    %161 = math.log %160 : vector<2x128xf32>
    %162 = arith.addf %154, %161 : vector<2x128xf32>
    %c10 = arith.constant 10 : index
    %c0_71 = arith.constant 0 : index
    %163 = vector.load %arg8[%c10, %c0_71] : memref<24x128xf32, #tpu.memory_space<vmem>>, vector<2x128xf32>
    tpu.vector_store %arg8[%c10, %c0_71], %152 {strides = array<i32>} : memref<24x128xf32, #tpu.memory_space<vmem>>, vector<2x128xf32>,
    %cst_72 = arith.constant 5.000000e-01 : f32
    %164 = vector.broadcast %cst_72 : f32 to vector<2x128xf32>
    %165 = arith.mulf %164, %162 : vector<2x128xf32>
    %166 = math.exp %165 : vector<2x128xf32>
    %c22 = arith.constant 22 : index
    %c0_73 = arith.constant 0 : index
    %167 = vector.load %arg8[%c22, %c0_73] : memref<24x128xf32, #tpu.memory_space<vmem>>, vector<2x128xf32>
    tpu.vector_store %arg8[%c22, %c0_73], %166 {strides = array<i32>} : memref<24x128xf32, #tpu.memory_space<vmem>>, vector<2x128xf32>,
    return
  }
  func.func @transform_0(%arg0: i32) -> (i32, i32) {
    %c0_i32 = arith.constant 0 : i32
    %c0_i32_0 = arith.constant 0 : i32
    return %c0_i32, %arg0 : i32, i32
  }
  func.func @transform_1(%arg0: i32) -> (i32, i32) {
    %c0_i32 = arith.constant 0 : i32
    %c0_i32_0 = arith.constant 0 : i32
    %c0_i32_1 = arith.constant 0 : i32
    return %c0_i32, %c0_i32_0 : i32, i32
  }
  func.func @transform_2(%arg0: i32) -> (i32, i32) {
    %c0_i32 = arith.constant 0 : i32
    %c0_i32_0 = arith.constant 0 : i32
    %c0_i32_1 = arith.constant 0 : i32
    return %c0_i32, %c0_i32_0 : i32, i32
  }
  func.func @transform_3(%arg0: i32) -> (i32, i32) {
    %c0_i32 = arith.constant 0 : i32
    %c0_i32_0 = arith.constant 0 : i32
    %c0_i32_1 = arith.constant 0 : i32
    return %c0_i32, %c0_i32_0 : i32, i32
  }
  func.func @transform_4(%arg0: i32) -> (i32, i32) {
    %c0_i32 = arith.constant 0 : i32
    %c0_i32_0 = arith.constant 0 : i32
    %c0_i32_1 = arith.constant 0 : i32
    return %c0_i32, %c0_i32_0 : i32, i32
  }
  func.func @transform_5(%arg0: i32) -> (i32, i32) {
    %c0_i32 = arith.constant 0 : i32
    %c0_i32_0 = arith.constant 0 : i32
    %c0_i32_1 = arith.constant 0 : i32
    return %c0_i32, %c0_i32_0 : i32, i32
  }
  func.func @transform_6(%arg0: i32) -> (i32, i32) {
    %c0_i32 = arith.constant 0 : i32
    %c0_i32_0 = arith.constant 0 : i32
    %c0_i32_1 = arith.constant 0 : i32
    return %c0_i32, %c0_i32_0 : i32, i32
  }
  func.func @transform_7(%arg0: i32) -> (i32, i32) {
    %c0_i32 = arith.constant 0 : i32
    %c0_i32_0 = arith.constant 0 : i32
    return %c0_i32, %arg0 : i32, i32
  }
}

</mosaic_0001>

<bundles_post_ra>
// kernel: tpu_custom_call.1
= control target key start
LH: loop header
LB: loop body
LE: loop exit
PB: predicated region body
PF: predicated region fallthrough
CT: control target
= control target key end

     0   :  { %v822_v3 = vmov 0   ;;  %vm32_vm0 = vcmask 64512   ;;  %s1125_s0 = inlined_call_operand.vmem [shape: f32[8,128], index: 0, kind: input, shape index: {}]   ;;  %s1126_s1 = inlined_call_operand.vmem [shape: f32[32,6], index: 1, kind: input, shape index: {}]   ;;  %s1127_s2 = inlined_call_operand.vmem [shape: f32[32,8], index: 2, kind: input, shape index: {}]   ;;  %s1128_s3 = inlined_call_operand.vmem [shape: f32[32,32], index: 3, kind: input, shape index: {}]   ;;  %s1129_s4 = inlined_call_operand.vmem [shape: f32[32,1], index: 4, kind: input, shape index: {}]   ;;  %s1130_s5 = inlined_call_operand.vmem [shape: f32[2,32], index: 5, kind: input, shape index: {}]   ;;  %s1131_s6 = inlined_call_operand.vmem [shape: f32[2,1], index: 6, kind: input, shape index: {}]   ;;  %s1132_s7 = inlined_call_operand.hbm [shape: f32[24,128], index: 7, kind: output, shape index: {}]  }
   0x1   :  { %v31_v0 = vld [vmem:[%s1125_s0] sm:$0xff]  ;;  %v86_v1 = vld [vmem:[%s1129_s4 + $0x18] sm:$0xff]  ;;  %742 = vset.pattern.permute.xlu2 %v822_v3  ;;  %741 = vset.pattern.permute.xlu1 %v822_v3  ;;  %v75_v4 = vld [vmem:[%s1126_s1 + $0x8] sm:$0xff] }
   0x2   :  { %v880_v2 = vld [vmem:[%s1126_s1 + $0x18] sm:$0xff]  ;;  %v27_v5 = vld [vmem:[%s1127_s2] sm:$0xff]  ;;  %740 = vset.pattern.permute.xlu0 %v822_v3  ;;  %60 = vmatpush.msra.mxu0 %v31_v0 }
   0x3   :  { %104 = vperm.xlu2 %742, %v86_v1   ;;  %130 = vperm.xlu0 %740, %v880_v2  }
   0x4   :  { %120 = vperm.xlu1 %741, %v75_v4   ;;  %697 = vmatmul.msk.f32.vlgmr.msra.gmra.mxu0 %vm32_vm0, %v27_v5 }
   0x5   :  { %12 = vsyncpa [#allocation3], 0  ;;  %v85_v6 = vld [vmem:[%s1129_s4 + $0x10] sm:$0xff]  ;;  %v74_v8 = vld [vmem:[%s1126_s1] sm:$0xff]  ;;  %v823_v13 = vmov 1   ;;  %v824_v15 = vmov 2  }
   0x6   :  { %v76_v7 = vld [vmem:[%s1126_s1 + $0x10] sm:$0xff]  ;;  %v28_v9 = vld [vmem:[%s1127_s2 + $0x8] sm:$0xff]  ;;  %v83_v11 = vld [vmem:[%s1129_s4] sm:$0xff]  ;;  %v825_v16 = vmov 3   ;;  %v826_v17 = vmov 5   ;;  %v827_v18 = vmov 4  }
   0x7   :  { %v84_v10 = vld [vmem:[%s1129_s4 + $0x8] sm:$0xff]  ;;  %v29_v12 = vld [vmem:[%s1127_s2 + $0x10] sm:$0xff]  ;;  %v30_v14 = vld [vmem:[%s1127_s2 + $0x18] sm:$0xff]  ;;  %vm141_vm1 = vcmask 261120   ;;  %s685_s12 = sshll.u32 %s1132_s7, 4  ;;  %s829_s13 = smov 128   ;;  %s686_s12 = int_to_ptr.hbm [resolvable:$true] %s685_s12 }
   0x8   :  { %v973_v56 = vld [vmem:[%s1128_s3] sm:$0xff]  ;;  %v983_v60 = vld [vmem:[%s1128_s3 + $0x8] sm:$0xff]  ;;  %v993_v5 = vld [vmem:[%s1128_s3 + $0x10] sm:$0xff]  ;;  %s830_s14 = smov 8  }
   0xb   :  { %99 = vperm.xlu2 %742, %v85_v6   ;;  %125 = vperm.xlu0 %740, %v76_v7   ;;  %v1000_v6 = vld [vmem:[%s1128_s3 + $0x18] sm:$0xff] }
   0xc   :  { %115 = vperm.xlu1 %741, %v74_v8   ;;  %698 = vmatmul.msk.f32.gmra.mxu0 %vm32_vm0, %v28_v9 }
  0x13   :  { %743 = vset.pattern.permute.xlu2 %v823_v13  ;;  %94 = vperm.xlu0 %740, %v84_v10  }
  0x14   :  { %89 = vperm.xlu1 %741, %v83_v11   ;;  %699 = vmatmul.msk.f32.gmra.mxu0 %vm32_vm0, %v29_v12 }
  0x15   :  { %237 = vperm.xlu2 %743, %v880_v2  }
  0x1b   :  { %744 = vset.pattern.permute.xlu0 %v823_v13 }
  0x1c   :  { %745 = vset.pattern.permute.xlu1 %v823_v13  ;;  %700 = vmatmul.msk.f32.gmra.mxu0 %vm32_vm0, %v30_v14 }
  0x1d   :  { %233 = vperm.xlu0 %744, %v76_v7   ;;  %225 = vperm.xlu2 %743, %v74_v8  }
  0x1e   :  { %229 = vperm.xlu1 %745, %v75_v4  }
  0x25   :  { %748 = vset.pattern.permute.xlu0 %v824_v15  ;;  %747 = vset.pattern.permute.xlu2 %v824_v15 }
  0x26   :  { %746 = vset.pattern.permute.xlu1 %v824_v15  ;;  %320 = vperm.xlu0 %748, %v75_v4  }
  0x27   :  { %324 = vperm.xlu2 %747, %v76_v7   ;;  %328 = vperm.xlu1 %746, %v880_v2  }
  0x2e   :  { %751 = vset.pattern.permute.xlu0 %v825_v16 }
  0x2f   :  { %749 = vset.pattern.permute.xlu2 %v825_v16  ;;  %316 = vperm.xlu1 %746, %v74_v8  }
  0x30   :  { %407 = vperm.xlu0 %751, %v74_v8   ;;  %419 = vperm.xlu2 %749, %v880_v2  }
  0x37   :  { %750 = vset.pattern.permute.xlu1 %v825_v16 }
  0x38   :  { %755 = vset.pattern.permute.xlu0 %v826_v17  ;;  %411 = vperm.xlu2 %749, %v75_v4  }
  0x39   :  { %415 = vperm.xlu1 %750, %v76_v7   ;;  %597 = vperm.xlu0 %755, %v76_v7  }
  0x40   :  { %753 = vset.pattern.permute.xlu2 %v827_v18 }
  0x41   :  { %752 = vset.pattern.permute.xlu1 %v827_v18  ;;  %506 = vperm.xlu2 %753, %v76_v7  }
  0x42   :  { %510 = vperm.xlu1 %752, %v880_v2  }
  0x49   :  { %502 = vperm.xlu2 %753, %v75_v4  }
  0x4a   :  { %754 = vset.pattern.permute.xlu1 %v826_v17 }
  0x4b   :  { %601 = vperm.xlu1 %754, %v880_v2  }
  0x51   :  { %757 = vset.pattern.permute.xlu2 %v826_v17 }
  0x52   :  { %593 = vperm.xlu2 %757, %v75_v4  }
  0x53   :  { %756 = vset.pattern.permute.xlu1 %v827_v18 }
  0x54   :  { %498 = vperm.xlu1 %756, %v74_v8  }
  0x5a   :  { %759 = vset.pattern.permute.xlu2 %v822_v3 }
  0x5c   :  { %758 = vset.pattern.permute.xlu1 %v826_v17 }
  0x5d   :  { %589 = vperm.xlu1 %758, %v74_v8   ;;  %v926_v19 = vpop.permute.xlu2 %104 }
  0x65   :  { %v928_v20 = vpop.permute.xlu2 %99 }
  0x6f   :  { %v930_v21 = vpop.permute.xlu2 %237 }
  0x75   :  { %v131_v22 = vpop.permute.xlu0 %130 }
  0x76   :  { %v121_v23 = vpop.permute.xlu1 %120 }
  0x77   :  { %v932_v24 = vpop.permute.xlu2 %225 }
  0x7d   :  { %v126_v25 = vpop.permute.xlu0 %125 }
  0x7e   :  { %v116_v26 = vpop.permute.xlu1 %115 }
  0x81   :  { %v325_v27 = vpop.permute.xlu2 %324  ;;  %v934_v28 = vpop.f32.mrf.mxu0 }
  0x82   :  { %v133_v51 = vadd.f32 %v116_v26, %v934_v28 }
  0x84   :  { %v137_v55 = vmax.f32 %v133_v51, 0.0 }
  0x85   :  { %v936_v29 = vpop.permute.xlu0 %94 }
  0x86   :  { %v938_v30 = vpop.permute.xlu1 %89 }
  0x89   :  { %v940_v31 = vpop.f32.mrf.mxu0 }
  0x8a   :  { %v420_v32 = vpop.permute.xlu2 %419  ;;  %v134_v49 = vadd.f32 %v121_v23, %v940_v31 }
  0x8c   :  { %v138_v52 = vmax.f32 %v134_v49, 0.0 }
  0x8f   :  { %v234_v33 = vpop.permute.xlu0 %233 }
  0x90   :  { %v230_v34 = vpop.permute.xlu1 %229 }
  0x91   :  { %v943_v35 = vadd.f32 %v230_v34, %v940_v31  ;;  %v945_v36 = vpop.f32.mrf.mxu0 }
  0x92   :  { %v412_v37 = vpop.permute.xlu2 %411  ;;  %v948_v38 = vadd.f32 %v234_v33, %v945_v36  ;;  %v951_v39 = vadd.f32 %v325_v27, %v945_v36  ;;  %v135_v45 = vadd.f32 %v126_v25, %v945_v36  ;;  %v1021_v25 = vld [vmem:[%s1130_s5] sm:$0x3]  ;;  %s828_s5 = smov [#allocation2]  }
  0x93   :  { %v423_v63 = vadd.f32 %v412_v37, %v940_v31  ;;  %v107_v27 = vld [vmem:[%s1131_s6] sm:$0x3]  ;;  %v245_v33 = vmax.f32 %v943_v35, 0.0  ;;  %s683_s6 = sshll.u32 %s828_s5, 4  ;;  %s684_s6 = int_to_ptr.vmem [resolvable:$true] %s683_s6 }
  0x94   :  { %v139_v50 = vmax.f32 %v135_v45, 0.0  ;;  %110 = vperm.xlu2 %759, %v107_v27  }
  0x95   :  { %v427_v3 = vmax.f32 %v423_v63, 0.0 }
  0x98   :  { %v321_v40 = vpop.permute.xlu0 %320 }
  0x99   :  { %v954_v41 = vadd.f32 %v321_v40, %v940_v31  ;;  %v956_v42 = vpop.permute.xlu1 %328  ;;  %v958_v43 = vpop.f32.mrf.mxu0 }
  0x9a   :  { %v136_v44 = vadd.f32 %v131_v22, %v958_v43  ;;  %v425_v53 = vadd.f32 %v420_v32, %v958_v43  ;;  %v243_v18 = vadd.f32 %v930_v21, %v958_v43  ;;  %v246_v21 = vmax.f32 %v948_v38, 0.0 }
  0x9b   :  { %v507_v46 = vpop.permute.xlu2 %506  ;;  %v240_v32 = vadd.f32 %v932_v24, %v934_v28 }
  0x9c   :  { %v963_v47 = vadd.f32 %v507_v46, %v945_v36  ;;  %v140_v48 = vmax.f32 %v136_v44, 0.0  ;;  %v429_v59 = vmax.f32 %v425_v53, 0.0  ;;  %v247_v26 = vmax.f32 %v243_v18, 0.0 }
  0x9d   :  { %v244_v37 = vmax.f32 %v240_v32, 0.0 }
  0x9e   :  { %166 = vmatpush.msra.mxu1 %v140_v48 }
  0xa0   :  { %167 = vmatpush.msra.mxu1 %v139_v50 }
  0xa1   :  { %v968_v54 = vpop.permute.xlu1 %316 }
  0xa2   :  { %168 = vmatpush.msra.mxu1 %v138_v52  ;;  %v408_v61 = vpop.permute.xlu0 %407 }
  0xa3   :  { %v503_v57 = vpop.permute.xlu2 %502  ;;  %v422_v1 = vadd.f32 %v408_v61, %v934_v28 }
  0xa4   :  { %v976_v58 = vadd.f32 %v503_v57, %v940_v31  ;;  %169 = vmatpush.msra.mxu1 %v137_v55 }
  0xa5   :  { %701 = vmatmul.msk.f32.vlgmr.msra.gmra.mxu1 %vm141_vm1, %v973_v56  ;;  %v426_v4 = vmax.f32 %v422_v1, 0.0 }
  0xa6   :  { %442 = vmatpush.msrb.mxu1 %v429_v59 }
  0xab   :  { %v416_v62 = vpop.permute.xlu1 %415 }
  0xac   :  { %v424_v0 = vadd.f32 %v416_v62, %v945_v36  ;;  %v594_v51 = vpop.permute.xlu2 %593 }
  0xad   :  { %702 = vmatmul.msk.f32.gmra.mxu1 %vm141_vm1, %v983_v60 }
  0xae   :  { %v428_v2 = vmax.f32 %v424_v0, 0.0 }
  0xb0   :  { %443 = vmatpush.msrb.mxu1 %v428_v2 }
  0xb2   :  { %444 = vmatpush.msrb.mxu1 %v427_v3 }
  0xb4   :  { %445 = vmatpush.msrb.mxu1 %v426_v4  ;;  %v1049_v2 = vpop.permute.xlu1 %510 }
  0xb5   :  { %703 = vmatmul.msk.f32.gmra.mxu1 %vm141_vm1, %v993_v5 }
  0xbd   :  { %704 = vmatmul.msk.f32.gmra.mxu1 %vm141_vm1, %v1000_v6 }
  0xc5   :  { %716 = vmatmul.msk.f32.vlgmr.msrb.gmra.mxu1 %vm141_vm1, %v973_v56 }
  0xcd   :  { %717 = vmatmul.msk.f32.gmra.mxu1 %vm141_vm1, %v983_v60 }
  0xd5   :  { %718 = vmatmul.msk.f32.gmra.mxu1 %vm141_vm1, %v993_v5 }
  0xdd   :  { %719 = vmatmul.msk.f32.gmra.mxu1 %vm141_vm1, %v1000_v6 }
  0xee   :  { %v1046_v52 = vpop.permute.xlu2 %110 }
 0x122   :  { %v171_v7 = vpop.f32.mrf.mxu1 }
 0x123   :  { %v172_v15 = vadd.f32 %v171_v7, %v938_v30 }
 0x125   :  { %v183_v23 = vmax.f32 %v172_v15, 0.0 }
 0x12a   :  { %v174_v8 = vpop.f32.mrf.mxu1 }
 0x12b   :  { %v175_v13 = vadd.f32 %v174_v8, %v936_v29 }
 0x12d   :  { %v184_v17 = vmax.f32 %v175_v13, 0.0 }
 0x132   :  { %v177_v9 = vpop.f32.mrf.mxu1 }
 0x133   :  { %v178_v11 = vadd.f32 %v177_v9, %v928_v20 }
 0x135   :  { %v185_v16 = vmax.f32 %v178_v11, 0.0 }
 0x13a   :  { %v180_v10 = vpop.f32.mrf.mxu1 }
 0x13b   :  { %v181_v12 = vadd.f32 %v180_v10, %v926_v19  ;;  %v602_v10 = vpop.permute.xlu1 %601 }
 0x13d   :  { %v186_v14 = vmax.f32 %v181_v12, 0.0 }
 0x13f   :  { %202 = vmatpush.msra.mxu3 %v186_v14 }
 0x141   :  { %203 = vmatpush.msra.mxu3 %v185_v16 }
 0x142   :  { %v447_v22 = vpop.f32.mrf.mxu1 }
 0x143   :  { %204 = vmatpush.msra.mxu3 %v184_v17  ;;  %v448_v46 = vadd.f32 %v447_v22, %v938_v30 }
 0x145   :  { %205 = vmatpush.msra.mxu3 %v183_v23  ;;  %v459_v50 = vmax.f32 %v448_v46, 0.0 }
 0x146   :  { %705 = vmatmul.msk.f32.vlgmr.msra.gmra.mxu3 %vm141_vm1, %v1021_v25 }
 0x147   :  { %260 = vmatpush.msrb.mxu3 %v247_v26  ;;  %v1055_v26 = vpop.permute.xlu1 %498 }
 0x149   :  { %261 = vmatpush.msrb.mxu3 %v246_v21  ;;  %v334_v21 = vadd.f32 %v956_v42, %v958_v43 }
 0x14a   :  { %v450_v34 = vpop.f32.mrf.mxu1 }
 0x14b   :  { %262 = vmatpush.msrb.mxu3 %v245_v33  ;;  %v451_v45 = vadd.f32 %v450_v34, %v936_v29  ;;  %v338_v33 = vmax.f32 %v334_v21, 0.0  ;;  %v331_v34 = vadd.f32 %v968_v54, %v934_v28 }
 0x14d   :  { %263 = vmatpush.msrb.mxu3 %v244_v37  ;;  %v460_v49 = vmax.f32 %v451_v45, 0.0  ;;  %v598_v37 = vpop.permute.xlu0 %597 }
 0x14e   :  { %706 = vmatmul.msk.f32.vlgmr.msrb.gmra.mxu3 %vm141_vm1, %v973_v56  ;;  %v606_v42 = vadd.f32 %v598_v37, %v945_v36 }
 0x14f   :  { %v590_v45 = vpop.permute.xlu1 %589 }
 0x150   :  { %v604_v54 = vadd.f32 %v590_v45, %v934_v28 }
 0x152   :  { %v453_v40 = vpop.f32.mrf.mxu1 }
 0x153   :  { %v454_v38 = vadd.f32 %v453_v40, %v928_v20  ;;  %v337_v40 = vmax.f32 %v951_v39, 0.0 }
 0x155   :  { %v461_v48 = vmax.f32 %v454_v38, 0.0  ;;  %v336_v38 = vmax.f32 %v954_v41, 0.0  ;;  %v608_v41 = vmax.f32 %v604_v54, 0.0 }
 0x156   :  { %707 = vmatmul.msk.f32.gmra.mxu3 %vm141_vm1, %v983_v60 }
 0x15a   :  { %v456_v44 = vpop.f32.mrf.mxu1 }
 0x15b   :  { %v457_v24 = vadd.f32 %v456_v44, %v926_v19  ;;  %v607_v44 = vadd.f32 %v602_v10, %v958_v43 }
 0x15d   :  { %v462_v35 = vmax.f32 %v457_v24, 0.0  ;;  %v335_v24 = vmax.f32 %v331_v34, 0.0  ;;  %v611_v46 = vmax.f32 %v607_v44, 0.0 }
 0x15e   :  { %708 = vmatmul.msk.f32.gmra.mxu3 %vm141_vm1, %v993_v5 }
 0x15f   :  { %475 = vmatpush.msra.mxu3 %v462_v35  ;;  %v605_v35 = vadd.f32 %v594_v51, %v940_v31 }
 0x161   :  { %476 = vmatpush.msra.mxu3 %v461_v48  ;;  %v610_v48 = vmax.f32 %v606_v42, 0.0  ;;  %v609_v39 = vmax.f32 %v605_v35, 0.0 }
 0x163   :  { %477 = vmatpush.msra.mxu3 %v460_v49 }
 0x165   :  { %478 = vmatpush.msra.mxu3 %v459_v50 }
 0x166   :  { %709 = vmatmul.msk.f32.gmra.mxu3 %vm141_vm1, %v1000_v6 }
 0x16e   :  { %720 = vmatmul.msk.f32.vlgmr.msra.gmra.mxu3 %vm141_vm1, %v1021_v25 }
 0x1c9   :  { %v207_v53 = vpop.f32.mrf.mxu3 }
 0x1ca   :  { %v208_v55 = vadd.f32 %v207_v53, %v1046_v52 }
 0x1cc   :  { %v211_v57 = vand.u32 2147483647, %v208_v55  ;;  %219 = vst [vmem:[#allocation2] sm:$0x3] %v208_v55  ;;  %v210_v7 = vmax.f32 %v208_v55, 0.0 }
 0x1ce   :  { %v212_v59 = vsub.f32 0.0, %v211_v57 }
 0x1d0   :  { %v213_v61 = vmul.f32 1.442695, %v212_v59 }
 0x1d1   :  { %v265_v62 = vpop.f32.mrf.mxu3 }
 0x1d2   :  { %760 = vpow2.f32 %v213_v61  ;;  %v266_v18 = vadd.f32 %v265_v62, %v938_v30 }
 0x1d4   :  { %v277_v32 = vmax.f32 %v266_v18, 0.0 }
 0x1d8   :  { %v761_v63 = vpop.eup %760 }
 0x1d9   :  { %v215_v0 = vadd.f32 1.0, %v761_v63  ;;  %v268_v1 = vpop.f32.mrf.mxu3 }
 0x1da   :  { %v269_v16 = vadd.f32 %v268_v1, %v936_v29 }
 0x1db   :  { %762 = vlog2.f32 %v215_v0 }
 0x1dc   :  { %v278_v27 = vmax.f32 %v269_v16, 0.0 }
 0x1e1   :  { %v763_v3 = vpop.eup %762  ;;  %v271_v4 = vpop.f32.mrf.mxu3 }
 0x1e2   :  { %v217_v8 = vmul.f32 0.6931472, %v763_v3  ;;  %v272_v14 = vadd.f32 %v271_v4, %v928_v20 }
 0x1e4   :  { %v218_v9 = vadd.f32 %v217_v8, %v210_v7  ;;  %v279_v22 = vmax.f32 %v272_v14, 0.0 }
 0x1e6   :  { %v220_v11 = vmul.f32 0.5, %v218_v9 }
 0x1e8   :  { %v221_v12 = vmul.f32 1.442695, %v220_v11 }
 0x1e9   :  { %v274_v13 = vpop.f32.mrf.mxu3 }
 0x1ea   :  { %764 = vpow2.f32 %v221_v12  ;;  %v275_v15 = vadd.f32 %v274_v13, %v926_v19 }
 0x1ec   :  { %v280_v17 = vmax.f32 %v275_v15, 0.0  ;;  %v516_v15 = vadd.f32 %v1049_v2, %v958_v43 }
 0x1ee   :  { %293 = vmatpush.msra.mxu2 %v280_v17  ;;  %v520_v18 = vmax.f32 %v516_v15, 0.0 }
 0x1f0   :  { %v765_v23 = vpop.eup %764  ;;  %294 = vmatpush.msra.mxu2 %v279_v22  ;;  %v519_v22 = vmax.f32 %v963_v47, 0.0 }
 0x1f1   :  { %223 = vst [vmem:[#allocation2 + $0xc] sm:$0x3] %v765_v23  ;;  %v513_v23 = vadd.f32 %v1055_v26, %v934_v28  ;;  %v480_v37 = vpop.f32.mrf.mxu3 }
 0x1f2   :  { %295 = vmatpush.msra.mxu2 %v278_v27  ;;  %v518_v27 = vmax.f32 %v976_v58, 0.0 }
 0x1f3   :  { %v517_v43 = vmax.f32 %v513_v23, 0.0 }
 0x1f4   :  { %296 = vmatpush.msra.mxu2 %v277_v32 }
 0x1f5   :  { %710 = vmatmul.msk.f32.vlgmr.msra.gmra.mxu2 %vm141_vm1, %v1021_v25 }
 0x1f6   :  { %351 = vmatpush.msrb.mxu2 %v338_v33 }
 0x1f8   :  { %352 = vmatpush.msrb.mxu2 %v337_v40 }
 0x1fa   :  { %353 = vmatpush.msrb.mxu2 %v336_v38 }
 0x1fc   :  { %354 = vmatpush.msrb.mxu2 %v335_v24 }
 0x1fd   :  { %711 = vmatmul.msk.f32.vlgmr.msrb.gmra.mxu2 %vm141_vm1, %v973_v56 }
 0x1fe   :  { %624 = vmatpush.msra.mxu2 %v611_v46 }
 0x200   :  { %625 = vmatpush.msra.mxu2 %v610_v48 }
 0x202   :  { %626 = vmatpush.msra.mxu2 %v609_v39 }
 0x204   :  { %627 = vmatpush.msra.mxu2 %v608_v41 }
 0x205   :  { %712 = vmatmul.msk.f32.gmra.mxu2 %vm141_vm1, %v983_v60 }
 0x20d   :  { %713 = vmatmul.msk.f32.gmra.mxu2 %vm141_vm1, %v993_v5 }
 0x215   :  { %714 = vmatmul.msk.f32.gmra.mxu2 %vm141_vm1, %v1000_v6 }
 0x21d   :  { %726 = vmatmul.msk.f32.vlgmr.msra.gmra.mxu2 %vm141_vm1, %v973_v56 }
 0x225   :  { %727 = vmatmul.msk.f32.gmra.mxu2 %vm141_vm1, %v983_v60 }
 0x22d   :  { %728 = vmatmul.msk.f32.gmra.mxu2 %vm141_vm1, %v993_v5 }
 0x235   :  { %729 = vmatmul.msk.f32.gmra.mxu2 %vm141_vm1, %v1000_v6 }
 0x278   :  { %v298_v31 = vpop.f32.mrf.mxu2 }
 0x279   :  { %v299_v36 = vadd.f32 %v298_v31, %v1046_v52 }
 0x27b   :  { %v302_v49 = vand.u32 2147483647, %v299_v36  ;;  %310 = vst [vmem:[#allocation2 + $0x2] sm:$0x3] %v299_v36  ;;  %v301_v62 = vmax.f32 %v299_v36, 0.0 }
 0x27d   :  { %v303_v50 = vsub.f32 0.0, %v302_v49 }
 0x27f   :  { %v304_v51 = vmul.f32 1.442695, %v303_v50 }
 0x280   :  { %v356_v53 = vpop.f32.mrf.mxu2 }
 0x281   :  { %766 = vpow2.f32 %v304_v51  ;;  %v357_v12 = vadd.f32 %v356_v53, %v938_v30 }
 0x283   :  { %v368_v17 = vmax.f32 %v357_v12, 0.0 }
 0x287   :  { %v767_v55 = vpop.eup %766 }
 0x288   :  { %v306_v57 = vadd.f32 1.0, %v767_v55  ;;  %v359_v59 = vpop.f32.mrf.mxu2 }
 0x289   :  { %v360_v10 = vadd.f32 %v359_v59, %v936_v29 }
 0x28a   :  { %768 = vlog2.f32 %v306_v57 }
 0x28b   :  { %v369_v16 = vmax.f32 %v360_v10, 0.0 }
 0x290   :  { %v769_v61 = vpop.eup %768  ;;  %v362_v0 = vpop.f32.mrf.mxu2 }
 0x291   :  { %v308_v63 = vmul.f32 0.6931472, %v769_v61  ;;  %v363_v8 = vadd.f32 %v362_v0, %v928_v20 }
 0x293   :  { %v309_v1 = vadd.f32 %v308_v63, %v301_v62  ;;  %v370_v13 = vmax.f32 %v363_v8, 0.0 }
 0x295   :  { %v311_v3 = vmul.f32 0.5, %v309_v1 }
 0x297   :  { %v312_v4 = vmul.f32 1.442695, %v311_v3 }
 0x298   :  { %v365_v7 = vpop.f32.mrf.mxu2 }
 0x299   :  { %770 = vpow2.f32 %v312_v4  ;;  %v366_v9 = vadd.f32 %v365_v7, %v926_v19 }
 0x29b   :  { %v371_v11 = vmax.f32 %v366_v9, 0.0 }
 0x29d   :  { %384 = vmatpush.msrb.mxu0 %v371_v11 }
 0x29f   :  { %v771_v14 = vpop.eup %770  ;;  %385 = vmatpush.msrb.mxu0 %v370_v13 }
 0x2a0   :  { %314 = vst [vmem:[#allocation2 + $0xe] sm:$0x3] %v771_v14  ;;  %v629_v2 = vpop.f32.mrf.mxu2 }
 0x2a1   :  { %386 = vmatpush.msrb.mxu0 %v369_v16  ;;  %v630_v4 = vadd.f32 %v629_v2, %v938_v30 }
 0x2a3   :  { %387 = vmatpush.msrb.mxu0 %v368_v17 }
 0x2a4   :  { %715 = vmatmul.msk.f32.vlgmr.msrb.gmra.mxu0 %vm141_vm1, %v1021_v25 }
 0x2a5   :  { %533 = vmatpush.msra.mxu0 %v520_v18 }
 0x2a7   :  { %534 = vmatpush.msra.mxu0 %v519_v22 }
 0x2a8   :  { %v632_v33 = vpop.f32.mrf.mxu2 }
 0x2a9   :  { %535 = vmatpush.msra.mxu0 %v518_v27  ;;  %v633_v1 = vadd.f32 %v632_v33, %v936_v29 }
 0x2ab   :  { %536 = vmatpush.msra.mxu0 %v517_v43 }
 0x2ac   :  { %721 = vmatmul.msk.f32.vlgmr.msra.gmra.mxu0 %vm141_vm1, %v973_v56 }
 0x2b0   :  { %v635_v38 = vpop.f32.mrf.mxu2 }
 0x2b1   :  { %v636_v63 = vadd.f32 %v635_v38, %v928_v20 }
 0x2b3   :  { %v643_v7 = vmax.f32 %v636_v63, 0.0 }
 0x2b4   :  { %722 = vmatmul.msk.f32.gmra.mxu0 %vm141_vm1, %v983_v60 }
 0x2b8   :  { %v638_v36 = vpop.f32.mrf.mxu2 }
 0x2b9   :  { %v639_v59 = vadd.f32 %v638_v36, %v926_v19 }
 0x2bb   :  { %v644_v3 = vmax.f32 %v639_v59, 0.0 }
 0x2bc   :  { %723 = vmatmul.msk.f32.gmra.mxu0 %vm141_vm1, %v993_v5  ;;  %v481_v5 = vadd.f32 %v480_v37, %v1046_v52 }
 0x2be   :  { %v484_v44 = vand.u32 2147483647, %v481_v5  ;;  %492 = vst [vmem:[#allocation2 + $0x6] sm:$0x3] %v481_v5  ;;  %v483_v8 = vmax.f32 %v481_v5, 0.0 }
 0x2c0   :  { %v485_v45 = vsub.f32 0.0, %v484_v44 }
 0x2c2   :  { %v486_v46 = vmul.f32 1.442695, %v485_v45 }
 0x2c4   :  { %724 = vmatmul.msk.f32.gmra.mxu0 %vm141_vm1, %v1000_v6 }
 0x321   :  { %v389_v28 = vpop.f32.mrf.mxu0 }
 0x322   :  { %v390_v47 = vadd.f32 %v389_v28, %v1046_v52 }
 0x324   :  { %v393_v58 = vand.u32 2147483647, %v390_v47  ;;  %401 = vst [vmem:[#allocation2 + $0x4] sm:$0x3] %v390_v47  ;;  %v392_v42 = vmax.f32 %v390_v47, 0.0 }
 0x326   :  { %v394_v26 = vsub.f32 0.0, %v393_v58 }
 0x328   :  { %v395_v21 = vmul.f32 1.442695, %v394_v26 }
 0x329   :  { %v538_v32 = vpop.f32.mrf.mxu0 }
 0x32a   :  { %772 = vpow2.f32 %v395_v21  ;;  %v539_v53 = vadd.f32 %v538_v32, %v938_v30 }
 0x32c   :  { %v550_v0 = vmax.f32 %v539_v53, 0.0 }
 0x330   :  { %v773_v56 = vpop.eup %772 }
 0x331   :  { %v397_v34 = vadd.f32 1.0, %v773_v56  ;;  %v541_v60 = vpop.f32.mrf.mxu0 }
 0x332   :  { %v542_v49 = vadd.f32 %v541_v60, %v936_v29 }
 0x333   :  { %774 = vlog2.f32 %v397_v34 }
 0x334   :  { %776 = vpow2.f32 %v486_v46  ;;  %v551_v62 = vmax.f32 %v542_v49, 0.0 }
 0x339   :  { %v775_v40 = vpop.eup %774  ;;  %v544_v6 = vpop.f32.mrf.mxu0 }
 0x33a   :  { %v399_v24 = vmul.f32 0.6931472, %v775_v40  ;;  %v545_v41 = vadd.f32 %v544_v6, %v928_v20  ;;  %v777_v51 = vpop.eup %776  ;;  %v641_v20 = vmax.f32 %v630_v4, 0.0 }
 0x33b   :  { %v488_v57 = vadd.f32 1.0, %v777_v51 }
 0x33c   :  { %v400_v35 = vadd.f32 %v399_v24, %v392_v42  ;;  %v552_v55 = vmax.f32 %v545_v41, 0.0 }
 0x33e   :  { %v402_v48 = vmul.f32 0.5, %v400_v35 }
 0x340   :  { %v403_v54 = vmul.f32 1.442695, %v402_v48 }
 0x341   :  { %v547_v39 = vpop.f32.mrf.mxu0 }
 0x342   :  { %778 = vpow2.f32 %v403_v54  ;;  %v548_v31 = vadd.f32 %v547_v39, %v926_v19  ;;  %v642_v19 = vmax.f32 %v633_v1, 0.0 }
 0x343   :  { %780 = vlog2.f32 %v488_v57 }
 0x344   :  { %v553_v50 = vmax.f32 %v548_v31, 0.0 }
 0x346   :  { %566 = vmatpush.msrb.mxu3 %v553_v50 }
 0x348   :  { %v779_v61 = vpop.eup %778  ;;  %567 = vmatpush.msrb.mxu3 %v552_v55 }
 0x349   :  { %405 = vst [vmem:[#allocation2 + $0x10] sm:$0x3] %v779_v61  ;;  %v781_v9 = vpop.eup %780 }
 0x34a   :  { %568 = vmatpush.msrb.mxu3 %v551_v62  ;;  %v490_v10 = vmul.f32 0.6931472, %v781_v9 }
 0x34c   :  { %569 = vmatpush.msrb.mxu3 %v550_v0  ;;  %v491_v11 = vadd.f32 %v490_v10, %v483_v8 }
 0x34d   :  { %725 = vmatmul.msk.f32.vlgmr.msrb.gmra.mxu3 %vm141_vm1, %v1021_v25 }
 0x34e   :  { %657 = vmatpush.msra.mxu3 %v644_v3  ;;  %v493_v12 = vmul.f32 0.5, %v491_v11 }
 0x350   :  { %658 = vmatpush.msra.mxu3 %v643_v7  ;;  %v494_v29 = vmul.f32 1.442695, %v493_v12 }
 0x352   :  { %659 = vmatpush.msra.mxu3 %v642_v19  ;;  %782 = vpow2.f32 %v494_v29 }
 0x354   :  { %660 = vmatpush.msra.mxu3 %v641_v20 }
 0x355   :  { %730 = vmatmul.msk.f32.vlgmr.msra.gmra.mxu3 %vm141_vm1, %v1021_v25 }
 0x358   :  { %v783_v30 = vpop.eup %782 }
 0x359   :  { %496 = vst [vmem:[#allocation2 + $0x12] sm:$0x3] %v783_v30 }
 0x3d0   :  { %v571_v13 = vpop.f32.mrf.mxu3 }
 0x3d1   :  { %v572_v14 = vadd.f32 %v571_v13, %v1046_v52 }
 0x3d3   :  { %v575_v15 = vand.u32 2147483647, %v572_v14  ;;  %583 = vst [vmem:[#allocation2 + $0x8] sm:$0x3] %v572_v14  ;;  %v574_v26 = vmax.f32 %v572_v14, 0.0 }
 0x3d5   :  { %v576_v16 = vsub.f32 0.0, %v575_v15 }
 0x3d7   :  { %v577_v17 = vmul.f32 1.442695, %v576_v16 }
 0x3d8   :  { %v662_v18 = vpop.f32.mrf.mxu3 }
 0x3d9   :  { %784 = vpow2.f32 %v577_v17  ;;  %v663_v22 = vadd.f32 %v662_v18, %v1046_v52 }
 0x3db   :  { %v666_v23 = vand.u32 2147483647, %v663_v22  ;;  %674 = vst [vmem:[#allocation2 + $0xa] sm:$0x3] %v663_v22  ;;  %v665_v52 = vmax.f32 %v663_v22, 0.0 }
 0x3dd   :  { %v667_v27 = vsub.f32 0.0, %v666_v23 }
 0x3df   :  { %v785_v43 = vpop.eup %784  ;;  %v668_v28 = vmul.f32 1.442695, %v667_v27 }
 0x3e0   :  { %v579_v25 = vadd.f32 1.0, %v785_v43 }
 0x3e1   :  { %786 = vpow2.f32 %v668_v28 }
 0x3e2   :  { %788 = vlog2.f32 %v579_v25 }
 0x3e7   :  { %v787_v47 = vpop.eup %786 }
 0x3e8   :  { %v789_v58 = vpop.eup %788  ;;  %v670_v2 = vadd.f32 1.0, %v787_v47 }
 0x3e9   :  { %v581_v21 = vmul.f32 0.6931472, %v789_v58 }
 0x3ea   :  { %790 = vlog2.f32 %v670_v2 }
 0x3eb   :  { %v582_v32 = vadd.f32 %v581_v21, %v574_v26 }
 0x3ed   :  { %v584_v56 = vmul.f32 0.5, %v582_v32 }
 0x3ef   :  { %v585_v33 = vmul.f32 1.442695, %v584_v56 }
 0x3f0   :  { %v791_v34 = vpop.eup %790 }
 0x3f1   :  { %792 = vpow2.f32 %v585_v33  ;;  %v672_v60 = vmul.f32 0.6931472, %v791_v34 }
 0x3f3   :  { %v673_v37 = vadd.f32 %v672_v60, %v665_v52 }
 0x3f5   :  { %v675_v5 = vmul.f32 0.5, %v673_v37 }
 0x3f7   :  { %v793_v40 = vpop.eup %792  ;;  %v676_v6 = vmul.f32 1.442695, %v675_v5 }
 0x3f8   :  { %587 = vst [vmem:[#allocation2 + $0x14] sm:$0x3] %v793_v40 }
 0x3f9   :  { %794 = vpow2.f32 %v676_v6 }
 0x3ff   :  { %v795_v44 = vpop.eup %794 }
 0x400   :  { %678 = vst [vmem:[#allocation2 + $0x16] sm:$0x3] %v795_v44 }
 0x401   :  { %691 = dma.vmem_to_hbm [thread:$0]  %s684_s6, 384, %s686_s12, [#allocation3], %s829_s13, %s829_s13, %s830_s14  }
 0x402   :  { %820 = dma.done.wait [#allocation3], 384  }
 0x403   :  { %821 = vsyncadd [#allocation3], 4294966912 }
 0x404   :  { %696 = vsyncpa [#allocation3], 1 }

</bundles_post_ra>
